<compile_context>
chip_gen: v5e
topology: v5e:2x2
jax: 0.10.0
libtpu: 0.0.40
codegen_flags: <defaults>
</compile_context>

<pallas_src>
import functools
import math

import jax
import jax.numpy as jnp
import numpy as np
from jax import lax
from jax.experimental import pallas as pl
from jax.experimental.pallas import tpu as pltpu

F32_MIN = float(jnp.finfo(jnp.float32).min)
NEG_LARGE = -1e30  # finite "-inf": exp(NEG_LARGE - row_max) underflows to 0.


def _pick_tile(n, candidates=(256, 128, 64, 32, 16, 8)):
    """Largest candidate tile dividing n (capped at 256: v7x VMEM budget),
    else the full dim (always legal as a block shape)."""
    for t in candidates:
        if n % t == 0:
            return t
    return n


def _attn_q_tile(T, span):
    """Span-aware q/kv tile and padded sequence length.

    Small spans get a small tile so the W-block KV window tracks the band
    (less wasted exp/max/select work per row); large spans use 128/256 tiles
    to fill the MXU.  T is padded up to a tile multiple so the kernel never
    falls back to one giant block.
    """
    if span >= 160:
        tq = 256
    elif span >= 40:
        tq = 128
    else:
        tq = 64
    if T <= tq:
        t_pad = max(8, -(-T // 8) * 8)
        return t_pad, t_pad
    return tq, -(-T // tq) * tq


# ----------------------------------------------------------------------------
# Kernel 1: fused QKV projection.
#   x:(M,Fin) @ [Wq|Wk|Wv]:(Fin,3F) + b  ->  three lane-dense bf16 (M,F) arrays.
#   M = B*T flattened; bf16 MXU operands, f32 accumulation, bf16 storage.
# ----------------------------------------------------------------------------
def _qkv_proj_kernel(x_ref, w_ref, b_ref, q_ref, k_ref, v_ref, *, n_feat):
    x = x_ref[...].astype(jnp.bfloat16)                   # bf16 MXU operand
    y = jnp.dot(x, w_ref[...], preferred_element_type=jnp.float32)
    y = y + b_ref[...]
    q_ref[...] = y[:, :n_feat].astype(q_ref.dtype)
    k_ref[...] = y[:, n_feat:2 * n_feat].astype(k_ref.dtype)
    v_ref[...] = y[:, 2 * n_feat:].astype(v_ref.dtype)


def qkv_projection_pallas(x, w_qkv, b_qkv, out_dtype=jnp.bfloat16):
    """x: (M, Fin); w_qkv: (Fin, 3F) bf16; b_qkv: (1, 3F) f32 -> 3x (M, F)."""
    M, Fin = x.shape
    F3 = w_qkv.shape[1]
    n_feat = F3 // 3
    TM = _pick_tile(M)
    out = jax.ShapeDtypeStruct((M, n_feat), out_dtype)
    return pl.pallas_call(
        functools.partial(_qkv_proj_kernel, n_feat=n_feat),
        out_shape=[out, out, out],
        grid=(M // TM,),
        in_specs=[
            pl.BlockSpec((TM, Fin), lambda i: (i, 0)),
            pl.BlockSpec((Fin, F3), lambda i: (0, 0)),
            pl.BlockSpec((1, F3), lambda i: (0, 0)),
        ],
        out_specs=[pl.BlockSpec((TM, n_feat), lambda i: (i, 0))] * 3,
        compiler_params=pltpu.CompilerParams(dimension_semantics=("parallel",)),
    )(x, w_qkv, b_qkv)


# ----------------------------------------------------------------------------
# Kernel 2: generic dense linear  y = x @ W + b  on (B*T)-flattened rows.
# Used for the output projection and as fallback when q/k/v inputs differ.
# ----------------------------------------------------------------------------
def _linear_kernel(x_ref, w_ref, b_ref, o_ref):
    x = x_ref[...].astype(jnp.bfloat16)                   # bf16 MXU operand
    y = jnp.dot(x, w_ref[...], preferred_element_type=jnp.float32)
    o_ref[...] = (y + b_ref[...]).astype(o_ref.dtype)


def linear_pallas(x, w, b, out_dtype=jnp.float32):
    """x: (M, Fin), w: (Fin, Fout) bf16, b: (1, Fout) f32 -> (M, Fout)."""
    M, Fin = x.shape
    Fout = w.shape[1]
    TM = _pick_tile(M)
    return pl.pallas_call(
        _linear_kernel,
        out_shape=jax.ShapeDtypeStruct((M, Fout), out_dtype),
        grid=(M // TM,),
        in_specs=[
            pl.BlockSpec((TM, Fin), lambda i: (i, 0)),
            pl.BlockSpec((Fin, Fout), lambda i: (0, 0)),
            pl.BlockSpec((1, Fout), lambda i: (0, 0)),
        ],
        out_specs=pl.BlockSpec((TM, Fout), lambda i: (i, 0)),
        compiler_params=pltpu.CompilerParams(dimension_semantics=("parallel",)),
    )(x, w, b)


# ----------------------------------------------------------------------------
# Kernel 3: fixed-span (banded) attention with a rolling K/V window.
#   grid = (batch, q-tiles).  K/V live in HBM (pl.ANY); a (W+1)-slot VMEM ring
#   holds the W blocks covering the band window; per step only the newly
#   entering block is DMA'd (prefetched one step ahead).  Heads are unrolled
#   in-kernel with online softmax; output is one lane-dense (TQ, n_feat) bf16
#   block with heads already interleaved (no HBM split/merge transposes).
# ----------------------------------------------------------------------------
def _band_attn_kernel(len_ref, q_ref, k_hbm, v_hbm, o_ref,
                      kbuf, vbuf, ksem, vsem,
                      *, n_head, d_k, TQ, NQ, W, RING, n_left, left, right,
                      scale):
    b = pl.program_id(0)
    qi = pl.program_id(1)
    length = len_ref[b]                    # SMEM scalar; read before DMA waits.

    def window_base(step):
        # First KV block covered by the band window of q-tile `step`.
        return jnp.clip(step - n_left, 0, NQ - W)

    base = window_base(qi)
    need_end = base + W                                        # window = [base, need_end)
    pref_end = window_base(jnp.minimum(qi + 1, NQ - 1)) + W    # next step's window end

    def start_block(j):
        slot = j % RING
        pltpu.make_async_copy(k_hbm.at[b * NQ + j], kbuf.at[slot], ksem.at[slot]).start()
        pltpu.make_async_copy(v_hbm.at[b * NQ + j], vbuf.at[slot], vsem.at[slot]).start()

    def wait_block(j):
        slot = j % RING
        pltpu.make_async_copy(k_hbm.at[b * NQ + j], kbuf.at[slot], ksem.at[slot]).wait()
        pltpu.make_async_copy(v_hbm.at[b * NQ + j], vbuf.at[slot], vsem.at[slot]).wait()

    # ---- rolling-window DMA schedule: each KV block is DMA'd once per batch ----
    @pl.when(qi == 0)
    def _():                               # initial window of this batch
        for j in range(W):                 # static unroll
            start_block(j)

    # Prefetch the (at most one) block entering the window at the next q-step so
    # its DMA overlaps this step's compute.  Slot safety: the prefetch slot is
    # never part of the current window (ring has W+1 slots).
    issue_floor = jnp.where(qi == 0, W, need_end)

    @pl.when(pref_end - 1 >= issue_floor)
    def _():
        start_block(pref_end - 1)

    @pl.when(qi == 0)
    def _():
        for j in range(W):
            wait_block(j)

    @pl.when((qi > 0) & (base > window_base(qi - 1)))
    def _():                               # block issued (prefetched) last step
        wait_block(need_end - 1)

    # ---- compute --------------------------------------------------------------
    # 1/sqrt(d_k) folded into q once per q-tile (not per head score tile).
    q_s = (q_ref[...].astype(jnp.float32) * scale).astype(jnp.bfloat16)  # (TQ, F)

    q_start = qi * TQ
    rows = q_start + lax.broadcasted_iota(jnp.int32, (TQ, 1), 0)
    # A row is fully masked iff its whole [row-left, row+right] window lies at or
    # beyond `length` (prefix key mask); the reference zeroes such rows.
    row_valid = jnp.maximum(rows - left, 0) < length

    m = [jnp.full((TQ, 1), NEG_LARGE, jnp.float32) for _ in range(n_head)]
    l = [jnp.zeros((TQ, 1), jnp.float32) for _ in range(n_head)]
    acc = [jnp.zeros((TQ, d_k), jnp.float32) for _ in range(n_head)]

    for w in range(W):                                     # static unroll over window
        slot = (base + w) % RING
        k_blk = kbuf[slot]                                 # (TQ, F) bf16, read once
        v_blk = vbuf[slot]
        cols = (base + w) * TQ + lax.broadcasted_iota(jnp.int32, (TQ, TQ), 1)
        # Band + key-length mask, built once per (q-tile, block), shared by heads.
        valid = (cols >= rows - left) & (cols <= rows + right) & (cols < length)
        for h in range(n_head):                            # static unroll over heads
            hs = slice(h * d_k, (h + 1) * d_k)
            # Contract last axes directly: no K transpose through the XLU.
            s = lax.dot_general(q_s[:, hs], k_blk[:, hs],
                                (((1,), (1,)), ((), ())),
                                preferred_element_type=jnp.float32)
            s = jnp.where(valid, s, NEG_LARGE)
            m_new = jnp.maximum(m[h], jnp.max(s, axis=-1, keepdims=True))
            alpha = jnp.exp(m[h] - m_new)
            p = jnp.exp(s - m_new)                         # masked cols underflow to 0
            l[h] = alpha * l[h] + jnp.sum(p, axis=-1, keepdims=True)
            acc[h] = alpha * acc[h] + jnp.dot(p.astype(jnp.bfloat16), v_blk[:, hs],
                                              preferred_element_type=jnp.float32)
            m[h] = m_new

    # Normalize AFTER the PV matmul on the (TQ, d_k) context, not on (TQ, KV).
    ctxs = [acc[h] * pl.reciprocal(l[h], approx=True) for h in range(n_head)]
    ctx = ctxs[0] if n_head == 1 else jnp.concatenate(ctxs, axis=-1)
    ctx = jnp.where(row_valid, ctx, 0.0)   # torch masked_fill(..., 0.0) on dead rows
    o_ref[...] = ctx.astype(o_ref.dtype)   # single lane-dense (TQ, n_feat) bf16 store


def fixed_span_attention_pallas(q, k, v, lengths, *, n_head, left, right):
    """q/k/v: (B, T, n_feat) bf16; lengths: (B,) int32 -> (B, T, n_feat) bf16."""
    B, T, n_feat = q.shape
    d_k = n_feat // n_head
    span = left + right + 1
    TQ, T_pad = _attn_q_tile(T, span)
    if T_pad != T:
        pad = ((0, 0), (0, T_pad - T), (0, 0))
        q = jnp.pad(q, pad)
        k = jnp.pad(k, pad)
        v = jnp.pad(v, pad)
    NQ = T_pad // TQ
    n_left = -(-left // TQ)                               # ceil
    n_right = -(-right // TQ)
    W = min(n_left + 1 + n_right, NQ)                     # KV blocks per band window
    RING = W + 1                                          # +1 slot for 1-deep prefetch
    scale = 1.0 / math.sqrt(d_k)

    kernel = functools.partial(
        _band_attn_kernel, n_head=n_head, d_k=d_k, TQ=TQ, NQ=NQ, W=W, RING=RING,
        n_left=n_left, left=left, right=right, scale=scale)

    def qo_map(b, qi, lens):
        return (b, qi, 0)

    grid_spec = pltpu.PrefetchScalarGridSpec(
        num_scalar_prefetch=1,                            # lengths -> SMEM
        grid=(B, NQ),
        in_specs=[
            pl.BlockSpec((None, TQ, n_feat), qo_map),     # q tile (auto pipelined)
            pl.BlockSpec(memory_space=pl.ANY),            # K blocks (B*NQ, TQ, F) in HBM
            pl.BlockSpec(memory_space=pl.ANY),            # V blocks
        ],
        out_specs=pl.BlockSpec((None, TQ, n_feat), qo_map),
        scratch_shapes=[
            pltpu.VMEM((RING, TQ, n_feat), jnp.bfloat16),   # K ring
            pltpu.VMEM((RING, TQ, n_feat), jnp.bfloat16),   # V ring
            pltpu.SemaphoreType.DMA((RING,)),
            pltpu.SemaphoreType.DMA((RING,)),
        ])
    out = pl.pallas_call(
        kernel,
        out_shape=jax.ShapeDtypeStruct((B, T_pad, n_feat), jnp.bfloat16),
        grid_spec=grid_spec,
        compiler_params=pltpu.CompilerParams(
            # The q-tile axis MUST run sequentially (ring-buffer DMA schedule);
            # the batch axis carries no cross-step state and can go megacore.
            dimension_semantics=("parallel", "arbitrary")),
    )(lengths, q,
      k.reshape(B * NQ, TQ, n_feat),
      v.reshape(B * NQ, TQ, n_feat))
    return out[:, :T] if T_pad != T else out


# ----------------------------------------------------------------------------
# Parameter preparation (one-time, hoisted out of the forward pass)
# ----------------------------------------------------------------------------
def prepare_params(params):
    """Fuse the QKV weights and pre-cast all matmul weights to bf16 (native MXU
    operand dtype); biases stay f32 and are added after f32 accumulation."""
    bf16, f32 = jnp.bfloat16, jnp.float32
    return {
        "w_qkv": jnp.concatenate([params["wq"], params["wk"], params["wv"]],
                                 axis=1).astype(bf16),
        "b_qkv": jnp.concatenate([params["bq"], params["bk"], params["bv"]],
                                 axis=1).astype(f32),
        "wq": params["wq"].astype(bf16), "bq": params["bq"].astype(f32),
        "wk": params["wk"].astype(bf16), "bk": params["bk"].astype(f32),
        "wv": params["wv"].astype(bf16), "bv": params["bv"].astype(f32),
        "wo": params["wo"].astype(bf16), "bo": params["bo"].astype(f32),
    }


# ----------------------------------------------------------------------------
# Full module forward (glue in plain JAX, hot paths in Pallas)
# ----------------------------------------------------------------------------
def mha_fixed_span_forward(prepped, query, key, value, mask, *,
                           n_head, span_size, span_ratio):
    B, T, n_feat = query.shape
    assert n_feat % n_head == 0
    left = int(span_size * span_ratio)
    right = span_size - left - 1

    # Key-padding mask -> per-batch valid length (scalar prefetch, no mask DMA).
    # TODO(synk): arbitrary non-prefix key masks would need the mask streamed
    # into the kernel (windowed int32 BlockSpec) instead of lengths.
    if mask is not None:
        lengths = jnp.sum((mask[:, 0, :] != 0).astype(jnp.int32), axis=-1)
    else:
        lengths = jnp.full((B,), T, jnp.int32)

    xq = query.reshape(B * T, n_feat)
    if (query is key) and (key is value):
        # Self-attention: fused QKV -- activation read from HBM once, wide-N MXU.
        q2, k2, v2 = qkv_projection_pallas(xq, prepped["w_qkv"], prepped["b_qkv"])
    else:
        q2 = linear_pallas(xq, prepped["wq"], prepped["bq"], out_dtype=jnp.bfloat16)
        k2 = linear_pallas(key.reshape(B * T, n_feat), prepped["wk"], prepped["bk"],
                           out_dtype=jnp.bfloat16)
        v2 = linear_pallas(value.reshape(B * T, n_feat), prepped["wv"], prepped["bv"],
                           out_dtype=jnp.bfloat16)

    ctx = fixed_span_attention_pallas(
        q2.reshape(B, T, n_feat), k2.reshape(B, T, n_feat),
        v2.reshape(B, T, n_feat), lengths,
        n_head=n_head, left=left, right=right)            # (B, T, n_feat) bf16

    # TODO(synk): dropout_rate=0 in this module config -> dropout is identity.
    out = linear_pallas(ctx.reshape(B * T, n_feat), prepped["wo"], prepped["bo"],
                        out_dtype=jnp.float32)
    return out.reshape(B, T, n_feat)


# ----------------------------------------------------------------------------
# Pure-JAX reference implementing the literal torch unfold semantics (f32)
# ----------------------------------------------------------------------------
def reference_forward(params, query, key, value, mask, *,
                      n_head, span_size, span_ratio):
    B, T, n_feat = query.shape
    d_k = n_feat // n_head
    left = int(span_size * span_ratio)
    right = span_size - left - 1
    span = span_size

    def lin(x, w, b):
        return x @ w + b[0]

    def split_heads(x):
        return x.reshape(B, T, n_head, d_k).transpose(0, 2, 1, 3)

    q = split_heads(lin(query, params["wq"], params["bq"]))
    k = split_heads(lin(key, params["wk"], params["bk"]))
    v = split_heads(lin(value, params["wv"], params["bv"]))

    k_pad = jnp.pad(k, ((0, 0), (0, 0), (left, right), (0, 0)))
    v_pad = jnp.pad(v, ((0, 0), (0, 0), (left, right), (0, 0)))
    new_k = jnp.stack([k_pad[:, :, s:s + T] for s in range(span)], axis=3)
    new_v = jnp.stack([v_pad[:, :, s:s + T] for s in range(span)], axis=3)

    scores = jnp.einsum("bhtd,bhtsd->bhts", q, new_k) / math.sqrt(d_k)

    m_pad = jnp.pad(mask[:, 0, :], ((0, 0), (left, right)))            # (B, T+S-1)
    um = jnp.stack([m_pad[:, s:s + T] for s in range(span)], axis=-1)  # (B, T, S)
    masked = (um == 0)[:, None]                                        # (B,1,T,S)

    scores = jnp.where(masked, F32_MIN, scores)
    attn = jax.nn.softmax(scores, axis=-1)
    attn = jnp.where(masked, 0.0, attn)
    x = jnp.einsum("bhts,bhtsd->bhtd", attn, new_v)
    x = x.transpose(0, 2, 1, 3).reshape(B, T, n_feat)
    return lin(x, params["wo"], params["bo"])


# ----------------------------------------------------------------------------
if __name__ == "__main__":
    def make_params(rng, n_feat):
        ks = jax.random.split(rng, 8)

        def init_linear(kw, kb):
            # weights stored as (in, out) so the kernel computes x @ W + b
            w = 0.05 * jax.random.normal(kw, (n_feat, n_feat), jnp.float32)
            b = 0.05 * jax.random.normal(kb, (1, n_feat), jnp.float32)
            return w, b

        p = {}
        p["wq"], p["bq"] = init_linear(ks[0], ks[1])
        p["wk"], p["bk"] = init_linear(ks[2], ks[3])
        p["wv"], p["bv"] = init_linear(ks[4], ks[5])
        p["wo"], p["bo"] = init_linear(ks[6], ks[7])
        return p

    def length_mask(lengths, T):
        return (jnp.arange(T)[None, None, :]
                < jnp.asarray(lengths)[:, None, None]).astype(jnp.float32)

    root = jax.random.PRNGKey(0)

    # -- case 1: small self-attention config (fused QKV path, single tile,
    #            W=1 window) ------------------------------------------------
    B, T, n_feat, n_head = 2, 8, 32, 4
    span_size, span_ratio = 5, 0.5
    kp1, kx1 = jax.random.split(jax.random.fold_in(root, 1))
    params1 = make_params(kp1, n_feat)
    prepped1 = prepare_params(params1)
    x = jax.random.normal(kx1, (B, T, n_feat), jnp.float32)
    mask1 = length_mask([T, T - 2], T)

    out1 = mha_fixed_span_forward(prepped1, x, x, x, mask1, n_head=n_head,
                                  span_size=span_size, span_ratio=span_ratio)
    out1 = jax.block_until_ready(out1)
    ref1 = reference_forward(params1, x, x, x, mask1, n_head=n_head,
                             span_size=span_size, span_ratio=span_ratio)
    # bf16 MXU operands + bf16 weights/ctx + approx reciprocal -> loose tolerance.
    np.testing.assert_allclose(np.asarray(out1), np.asarray(ref1),
                               rtol=4e-2, atol=2e-2)

    # -- case 2: banded config (span=32 -> TQ=64, NQ=4, W=3 rolling window
    #            with prefetch, distinct q/k/v inputs -> separate projection
    #            path, partially + fully masked query rows) ------------------
    B2, T2, F2, H2 = 2, 256, 128, 4
    span2, ratio2 = 32, 0.5
    kp2, kq2, kk2, kv2 = jax.random.split(jax.random.fold_in(root, 2), 4)
    params2 = make_params(kp2, F2)
    prepped2 = prepare_params(params2)
    q_in = jax.random.normal(kq2, (B2, T2, F2), jnp.float32)
    k_in = jax.random.normal(kk2, (B2, T2, F2), jnp.float32)
    v_in = jax.random.normal(kv2, (B2, T2, F2), jnp.float32)
    mask2 = length_mask([T2, T2 - 55], T2)

    out2 = mha_fixed_span_forward(prepped2, q_in, k_in, v_in, mask2, n_head=H2,
                                  span_size=span2, span_ratio=ratio2)
    out2 = jax.block_until_ready(out2)
    ref2 = reference_forward(params2, q_in, k_in, v_in, mask2, n_head=H2,
                             span_size=span2, span_ratio=ratio2)
    np.testing.assert_allclose(np.asarray(out2), np.asarray(ref2),
                               rtol=4e-2, atol=2e-2)

    print("KERNEL_OK")
</pallas_src>

<mosaic_0001>
module attributes {stable_mosaic.version = 11 : i64} {
  func.func @_qkv_proj_kernel(%arg0: i32, %arg1: memref<16x32xf32, #tpu.memory_space<vmem>>, %arg2: memref<32x96xbf16, #tpu.memory_space<vmem>>, %arg3: memref<1x96xf32, #tpu.memory_space<vmem>>, %arg4: memref<16x32xbf16, #tpu.memory_space<vmem>>, %arg5: memref<16x32xbf16, #tpu.memory_space<vmem>>, %arg6: memref<16x32xbf16, #tpu.memory_space<vmem>>) attributes {dimension_semantics = [#tpu.dimension_semantics<parallel>], iteration_bounds = array<i64: 1>, scalar_prefetch = 0 : i64, scratch_operands = 0 : i64, tpu.core_type = #tpu.core_type<tc>, window_params = [{transform_indices = @transform_0, window_bounds = array<i64: 16, 32>}, {pipeline_mode = #tpu.pipeline_mode<synchronous>, transform_indices = @transform_1, window_bounds = array<i64: 32, 96>}, {pipeline_mode = #tpu.pipeline_mode<synchronous>, transform_indices = @transform_2, window_bounds = array<i64: 1, 96>}, {transform_indices = @transform_3, window_bounds = array<i64: 16, 32>}, {transform_indices = @transform_4, window_bounds = array<i64: 16, 32>}, {transform_indices = @transform_5, window_bounds = array<i64: 16, 32>}]} {
    %c0 = arith.constant 0 : index
    %c0_0 = arith.constant 0 : index
    %0 = vector.load %arg1[%c0, %c0_0] : memref<16x32xf32, #tpu.memory_space<vmem>>, vector<16x32xf32>
    %1 = arith.truncf %0 : vector<16x32xf32> to vector<16x32xbf16>
    %c0_1 = arith.constant 0 : index
    %c0_2 = arith.constant 0 : index
    %2 = vector.load %arg2[%c0_1, %c0_2] : memref<32x96xbf16, #tpu.memory_space<vmem>>, vector<32x96xbf16>
    %cst = arith.constant dense<0.000000e+00> : vector<16x96xf32>
    %3 = tpu.matmul %1, %2, %cst {dimension_numbers = #tpu.dot_dimension_numbers<[1], [0], [0], [1], [0, 0, 1, 1], [], []>} : vector<16x32xbf16>, vector<32x96xbf16>, vector<16x96xf32> -> vector<16x96xf32>
    %c0_3 = arith.constant 0 : index
    %c0_4 = arith.constant 0 : index
    %4 = vector.load %arg3[%c0_3, %c0_4] : memref<1x96xf32, #tpu.memory_space<vmem>>, vector<1x96xf32>
    %5 = vector.broadcast %4 : vector<1x96xf32> to vector<16x96xf32>
    %6 = arith.addf %3, %5 : vector<16x96xf32>
    %7 = vector.extract_strided_slice %6 {offsets = [0, 0], sizes = [16, 32], strides = [1, 1]} : vector<16x96xf32> to vector<16x32xf32>
    %8 = arith.truncf %7 : vector<16x32xf32> to vector<16x32xbf16>
    %c0_5 = arith.constant 0 : index
    %c0_6 = arith.constant 0 : index
    %9 = vector.load %arg4[%c0_5, %c0_6] : memref<16x32xbf16, #tpu.memory_space<vmem>>, vector<16x32xbf16>
    tpu.vector_store %arg4[%c0_5, %c0_6], %8 {strides = array<i32>} : memref<16x32xbf16, #tpu.memory_space<vmem>>, vector<16x32xbf16>,
    %10 = vector.extract_strided_slice %6 {offsets = [0, 32], sizes = [16, 32], strides = [1, 1]} : vector<16x96xf32> to vector<16x32xf32>
    %11 = arith.truncf %10 : vector<16x32xf32> to vector<16x32xbf16>
    %c0_7 = arith.constant 0 : index
    %c0_8 = arith.constant 0 : index
    %12 = vector.load %arg5[%c0_7, %c0_8] : memref<16x32xbf16, #tpu.memory_space<vmem>>, vector<16x32xbf16>
    tpu.vector_store %arg5[%c0_7, %c0_8], %11 {strides = array<i32>} : memref<16x32xbf16, #tpu.memory_space<vmem>>, vector<16x32xbf16>,
    %13 = vector.extract_strided_slice %6 {offsets = [0, 64], sizes = [16, 32], strides = [1, 1]} : vector<16x96xf32> to vector<16x32xf32>
    %14 = arith.truncf %13 : vector<16x32xf32> to vector<16x32xbf16>
    %c0_9 = arith.constant 0 : index
    %c0_10 = arith.constant 0 : index
    %15 = vector.load %arg6[%c0_9, %c0_10] : memref<16x32xbf16, #tpu.memory_space<vmem>>, vector<16x32xbf16>
    tpu.vector_store %arg6[%c0_9, %c0_10], %14 {strides = array<i32>} : memref<16x32xbf16, #tpu.memory_space<vmem>>, vector<16x32xbf16>,
    return
  }
  func.func @transform_0(%arg0: i32) -> (i32, i32) {
    %c0_i32 = arith.constant 0 : i32
    %c0_i32_0 = arith.constant 0 : i32
    return %arg0, %c0_i32 : i32, i32
  }
  func.func @transform_1(%arg0: i32) -> (i32, i32) {
    %c0_i32 = arith.constant 0 : i32
    %c0_i32_0 = arith.constant 0 : i32
    %c0_i32_1 = arith.constant 0 : i32
    return %c0_i32, %c0_i32_0 : i32, i32
  }
  func.func @transform_2(%arg0: i32) -> (i32, i32) {
    %c0_i32 = arith.constant 0 : i32
    %c0_i32_0 = arith.constant 0 : i32
    %c0_i32_1 = arith.constant 0 : i32
    return %c0_i32, %c0_i32_0 : i32, i32
  }
  func.func @transform_3(%arg0: i32) -> (i32, i32) {
    %c0_i32 = arith.constant 0 : i32
    %c0_i32_0 = arith.constant 0 : i32
    return %arg0, %c0_i32 : i32, i32
  }
  func.func @transform_4(%arg0: i32) -> (i32, i32) {
    %c0_i32 = arith.constant 0 : i32
    %c0_i32_0 = arith.constant 0 : i32
    return %arg0, %c0_i32 : i32, i32
  }
  func.func @transform_5(%arg0: i32) -> (i32, i32) {
    %c0_i32 = arith.constant 0 : i32
    %c0_i32_0 = arith.constant 0 : i32
    return %arg0, %c0_i32 : i32, i32
  }
}

</mosaic_0001>

<bundles_post_ra>
// kernel: tpu_custom_call.1
= control target key start
LH: loop header
LB: loop body
LE: loop exit
PB: predicated region body
PF: predicated region fallthrough
CT: control target
= control target key end

     0   :  { %11 = vsyncpa [#allocation3], 0  ;;  %s399_s0 = inlined_call_operand.hbm [shape: f32[16,32], index: 0, kind: input, shape index: {}]   ;;  %s400_s1 = inlined_call_operand.hbm [shape: bf16[32,96], index: 1, kind: input, shape index: {}]   ;;  %s401_s2 = inlined_call_operand.vmem [shape: f32[1,96], index: 2, kind: input, shape index: {}]   ;;  %s402_s3 = inlined_call_operand.hbm [shape: bf16[16,32], index: 3, kind: output, shape index: {0}]   ;;  %s403_s4 = inlined_call_operand.hbm [shape: bf16[16,32], index: 4, kind: output, shape index: {1}]   ;;  %s404_s5 = inlined_call_operand.hbm [shape: bf16[16,32], index: 5, kind: output, shape index: {2}]  }
   0x1   :  { %12 = vsyncpa [#allocation6], 0 }
   0x2   :  { %13 = vsyncpa [#allocation4], 0 }
   0x3   :  { %14 = vsyncpa [#allocation9], 0  ;;  %s19_s20 = sshll.u32 %s399_s0, 4  ;;  %s321_s21 = smov [#allocation2]   ;;  %s20_s20 = int_to_ptr.hbm [resolvable:$true] %s19_s20 }
   0x4   :  { %s21_s22 = sshll.u32 %s321_s21, 4  ;;  %s32_s25 = sshll.u32 %s400_s1, 4  ;;  %s22_s22 = int_to_ptr.vmem [resolvable:$true] %s21_s22  ;;  %s33_s25 = int_to_ptr.hbm [resolvable:$true] %s32_s25 }
   0x5   :  { %s322_s26 = smov 128   ;;  %s323_s27 = smov 8  }
   0x6   :  { %27 = dma.hbm_to_vmem [thread:$0]  %s20_s20, 256, %s22_s22, [#allocation3], %s322_s26, %s322_s26, %s323_s27  }
   0x7   :  { %s324_s28 = smov [#allocation5]   ;;  %s325_s30 = smov 64  }
   0x8   :  { %s34_s29 = sshll.u32 %s324_s28, 4  ;;  %s326_s6 = smov 4   ;;  %s35_s29 = int_to_ptr.vmem [resolvable:$true] %s34_s29 }
   0x9   :  { %40 = dma.hbm_to_vmem [thread:$0]  %s33_s25, 256, %s35_s29, [#allocation6], %s325_s30, %s325_s30, %s326_s6  }
   0xa   :  { %313 = dma.done.wait [#allocation3], 256  }
   0xb   :  { %314 = vsyncadd [#allocation3], 4294967040 }
   0xc   :  { %315 = dma.done.wait [#allocation6], 256  }
   0xd   :  { %316 = vsyncadd [#allocation6], 4294967040  ;;  %v181_v0 = vld [vmem:[#allocation5 + $0x8] sm:$0xff]  ;;  %v180_v1 = vld [vmem:[#allocation5] sm:$0xff]  ;;  %vm75_vm0 = vcmask 261120   ;;  %vm95_vm1 = vcmask 257024  }
   0xe   :  { %85 = vmatpush.bf16.msra.mxu0 %v181_v0  ;;  %v52_v2 = vld [vmem:[#allocation2] sm:$0xff]  ;;  %v53_v3 = vld [vmem:[#allocation2 + $0x8] sm:$0xff]  ;;  %s327_s7 = smov 96   ;;  %s328_s8 = smov [#allocation7]  }
   0xf   :  { %v54_v4 = vpack.c.bf16 %v53_v3, %v52_v2  ;;  %v192_v5 = vld [vmem:[%s401_s2] ss:$0 sm:$0xff]  ;;  %s120_s9 = sshll.u32 %s328_s8, 4  ;;  %s122_s12 = sshll.u32 %s402_s3, 4  ;;  %s121_s9 = int_to_ptr.vmem [resolvable:$true] %s120_s9  ;;  %s123_s12 = int_to_ptr.hbm [resolvable:$true] %s122_s12 }
  0x10   :  { %s329_s2 = smov [#allocation8]   ;;  %s135_s15 = sshll.u32 %s403_s4, 4  ;;  %s136_s15 = int_to_ptr.hbm [resolvable:$true] %s135_s15 }
  0x11   :  { %s133_s3 = sshll.u32 %s329_s2, 4  ;;  %s330_s16 = smov [#allocation10]   ;;  %s134_s3 = int_to_ptr.vmem [resolvable:$true] %s133_s3 }
  0x12   :  { %86 = vmatpush.bf16.msra.mxu0 %v180_v1  ;;  %s146_s17 = sshll.u32 %s330_s16, 4  ;;  %s148_s20 = sshll.u32 %s404_s5, 4  ;;  %s147_s17 = int_to_ptr.vmem [resolvable:$true] %s146_s17  ;;  %s149_s20 = int_to_ptr.hbm [resolvable:$true] %s148_s20 }
  0x15   :  { %179 = vmatmul.msk.bf16.vlgmr.msra.gmra.mxu0 %vm75_vm0, %v54_v4 }
  0x92   :  { %v88_v6 = vpop.f32.mrf.mxu0 }
  0x93   :  { %v89_v7 = vadd.f32 %v192_v5, %v88_v6 }
  0x95   :  { %v93_v8 = vpack.c.bf16 %v89_v7, %v89_v7 }
  0x97   :  { %96 = vst.msk [vmem:[#allocation7] sm:$0xf] %vm95_vm1, %v93_v8  ;;  %108 = vrot.lane.b32.xlu1 %v93_v8, %s325_s30  ;;  %100 = vrot.lane.b32.xlu0 %v93_v8, %s327_s7 }
  0x9a   :  { %v90_v9 = vpop.f32.mrf.mxu0 }
  0x9b   :  { %v91_v10 = vadd.f32 %v192_v5, %v90_v9 }
  0x9d   :  { %v94_v11 = vpack.c.bf16 %v91_v10, %v91_v10 }
  0x9f   :  { %97 = vst.msk [vmem:[#allocation7 + $0x4] sm:$0xf] %vm95_vm1, %v94_v11  ;;  %110 = vrot.lane.b32.xlu1 %v94_v11, %s325_s30  ;;  %102 = vrot.lane.b32.xlu0 %v94_v11, %s327_s7 }
  0xa0   :  { %128 = dma.vmem_to_hbm [thread:$0]  %s121_s9, 128, %s123_s12, [#allocation4], %s325_s30, %s325_s30, %s326_s6  }
 0x109   :  { %v109_v12 = vpop.permute.xlu1 %108  ;;  %v101_v13 = vpop.permute.xlu0 %100 }
 0x10a   :  { %114 = vst.msk [vmem:[#allocation10] sm:$0xf] %vm95_vm1, %v109_v12 }
 0x10b   :  { %106 = vst.msk [vmem:[#allocation8] sm:$0xf] %vm95_vm1, %v101_v13 }
 0x111   :  { %v111_v14 = vpop.permute.xlu1 %110  ;;  %v103_v15 = vpop.permute.xlu0 %102 }
 0x112   :  { %115 = vst.msk [vmem:[#allocation10 + $0x4] sm:$0xf] %vm95_vm1, %v111_v14 }
 0x113   :  { %107 = vst.msk [vmem:[#allocation8 + $0x4] sm:$0xf] %vm95_vm1, %v103_v15 }
 0x114   :  { %141 = dma.vmem_to_hbm [thread:$0]  %s134_s3, 128, %s136_s15, [#allocation9], %s325_s30, %s325_s30, %s326_s6  }
 0x115   :  { %154 = dma.vmem_to_hbm [thread:$0]  %s147_s17, 128, %s149_s20, [#allocation9], %s325_s30, %s325_s30, %s326_s6  }
 0x116   :  { %317 = dma.done.wait [#allocation4], 128  }
 0x117   :  { %318 = vsyncadd [#allocation4], 4294967168 }
 0x118   :  { %319 = dma.done.wait [#allocation9], 256  }
 0x119   :  { %320 = vsyncadd [#allocation9], 4294967040 }
 0x11a   :  { %167 = vsyncpa [#allocation3], 1 }
 0x11b   :  { %168 = vsyncpa [#allocation6], 1 }
 0x11c   :  { %169 = vsyncpa [#allocation4], 1 }
 0x11d   :  { %170 = vsyncpa [#allocation9], 1 }

</bundles_post_ra>
